<compile_context>
chip_gen: v7x
topology: tpu7x:2x2x1
jax: 0.10.0
libtpu: 0.0.40
codegen_flags: <defaults>
</compile_context>

<pallas_src>
import functools

import numpy as np
import jax
import jax.numpy as jnp
from jax.experimental import pallas as pl
from jax.experimental.pallas import tpu as pltpu

LANE = 128      # lane width of a TPU vreg (last dim)
SUBLANE = 8     # sublane count (second-to-last dim)
ROW_TILE_CAP = 1024


def _round_up(x, m):
    return (x + m - 1) // m * m


# ----------------------------------------------------------------------------
# Fused MLP kernel: linear4(relu(linear3(relu(linear2(relu(linear1(x)))))))
# Weights are VMEM-resident bf16 (in, out); biases are f32 (1, out).
# ----------------------------------------------------------------------------
def mlp_kernel(x_ref, w1_ref, b1_ref, w2_ref, b2_ref, w3_ref, b3_ref,
               w4_ref, b4_ref, o_ref):
    bf16 = jnp.bfloat16
    # bf16 operands on the MXU, f32 accumulation; bias-add + ReLU in f32 (VPU).
    h = jnp.dot(x_ref[...].astype(bf16), w1_ref[...],
                preferred_element_type=jnp.float32)
    h = jnp.maximum(h + b1_ref[...], 0.0)
    h = jnp.dot(h.astype(bf16), w2_ref[...], preferred_element_type=jnp.float32)
    h = jnp.maximum(h + b2_ref[...], 0.0)
    # dropout(p=0.2) is identity in eval mode -> omitted
    h = jnp.dot(h.astype(bf16), w3_ref[...], preferred_element_type=jnp.float32)
    h = jnp.maximum(h + b3_ref[...], 0.0)
    # dropout(p=0.2) is identity in eval mode -> omitted
    o = jnp.dot(h.astype(bf16), w4_ref[...], preferred_element_type=jnp.float32)
    o_ref[...] = (o + b4_ref[...]).astype(o_ref.dtype)


def _choose_row_tile(m):
    if m <= SUBLANE:
        return m  # single block; block dims equal to the full array dims are legal
    # Aim for >= 2 grid steps (v7x has 2 TensorCores) while capping the tile.
    half = _round_up(pl.cdiv(m, 2), SUBLANE)
    return min(ROW_TILE_CAP, half)


# ----------------------------------------------------------------------------
# Wrapper: single fused pallas_call over a 1-D "parallel" row grid.
# ----------------------------------------------------------------------------
def ann_relu_forward(x, p, *, d_out):
    M, d_in = x.shape
    d_out_pad = p['w4'].shape[1]

    tm = _choose_row_tile(M)
    grid = (pl.cdiv(M, tm),)

    params = (p['w1'], p['b1'], p['w2'], p['b2'],
              p['w3'], p['b3'], p['w4'], p['b4'])

    def full_spec(arr):
        # Constant block index: fetched once, resident across all grid steps.
        return pl.BlockSpec(arr.shape, lambda i: (0, 0))

    n1 = p['w1'].shape[1]
    n2 = p['w2'].shape[1]
    n3 = p['w3'].shape[1]
    n4 = p['w4'].shape[1]
    flops = 2 * M * (d_in * n1 + n1 * n2 + n2 * n3 + n3 * n4)
    bytes_accessed = (x.size * x.dtype.itemsize
                      + sum(int(a.size) * a.dtype.itemsize for a in params)
                      + M * d_out_pad * 4)

    out = pl.pallas_call(
        mlp_kernel,
        out_shape=jax.ShapeDtypeStruct((M, d_out_pad), x.dtype),
        grid_spec=pltpu.PrefetchScalarGridSpec(
            num_scalar_prefetch=0,
            grid=grid,
            in_specs=[pl.BlockSpec((tm, d_in), lambda i: (i, 0))]  # x rows
                     + [full_spec(a) for a in params],
            out_specs=pl.BlockSpec((tm, d_out_pad), lambda i: (i, 0)),
        ),
        compiler_params=pltpu.CompilerParams(
            dimension_semantics=("parallel",)),
        cost_estimate=pl.CostEstimate(flops=flops, transcendentals=0,
                                      bytes_accessed=bytes_accessed),
    )(x, *params)

    return out[:, :d_out]


# ----------------------------------------------------------------------------
# Deterministic parameter init (matches nn.Linear default U(-1/sqrt(fan_in), .)).
# Returns (padded bf16/f32 params for the kernel, raw f32 params for reference).
# ----------------------------------------------------------------------------
def init_ann_relu_params(key, d_in, d_out):
    dims = [d_in, 180, 640, 180, d_out]
    # GEMM1 keeps its true K (no 32->128 over-padding); all output/feature dims
    # are zero-padded to lane-dense multiples of 128 (exact for Linear+ReLU).
    dims_pad = [d_in] + [_round_up(d, LANE) for d in dims[1:]]
    keys = jax.random.split(key, len(dims) - 1)

    padded, raw = {}, {}
    for idx, (kk, din, dout, dinp, doutp) in enumerate(
            zip(keys, dims[:-1], dims[1:], dims_pad[:-1], dims_pad[1:]), start=1):
        bound = 1.0 / np.sqrt(din)
        kw, kb = jax.random.split(kk)
        w = jax.random.uniform(kw, (dout, din), jnp.float32, -bound, bound)
        b = jax.random.uniform(kb, (dout,), jnp.float32, -bound, bound)
        raw[f'w{idx}'], raw[f'b{idx}'] = w, b
        # Pre-transpose to (in, out), zero-pad, store bf16 (MXU-native) ONCE.
        padded[f'w{idx}'] = (jnp.zeros((dinp, doutp), jnp.bfloat16)
                             .at[:din, :dout].set(w.T.astype(jnp.bfloat16)))
        # Biases stay f32: bias-add + ReLU run in f32 on the VPU.
        padded[f'b{idx}'] = (jnp.zeros((1, doutp), jnp.float32)
                             .at[0, :dout].set(b))
    return padded, raw


def ann_relu_ref(x, raw):
    h = jnp.maximum(x @ raw['w1'].T + raw['b1'], 0.0)
    h = jnp.maximum(h @ raw['w2'].T + raw['b2'], 0.0)
    h = jnp.maximum(h @ raw['w3'].T + raw['b3'], 0.0)
    return h @ raw['w4'].T + raw['b4']


# ----------------------------------------------------------------------------

if __name__ == "__main__":
    B, D_IN, D_OUT = 8, 32, 10

    key = jax.random.PRNGKey(0)
    kx, kp = jax.random.split(key)
    x = jax.random.normal(kx, (B, D_IN), jnp.float32)
    padded_params, raw_params = init_ann_relu_params(kp, D_IN, D_OUT)

    fwd = jax.jit(functools.partial(ann_relu_forward, d_out=D_OUT))
    out = jax.block_until_ready(fwd(x, padded_params))

    assert out.shape == (B, D_OUT)
    assert bool(jnp.all(jnp.isfinite(out)))
    ref = ann_relu_ref(x, raw_params)  # f32 reference; kernel uses bf16 MXU operands
    assert bool(jnp.allclose(out, ref, atol=2e-2, rtol=2e-2)), \
        float(jnp.max(jnp.abs(out - ref)))
    print("KERNEL_OK")
</pallas_src>

<mosaic_0001>
module attributes {stable_mosaic.version = 11 : i64} {
  func.func @mlp_kernel(%arg0: i32, %arg1: memref<8x32xf32, #tpu.memory_space<vmem>>, %arg2: memref<32x256xbf16, #tpu.memory_space<vmem>>, %arg3: memref<1x256xf32, #tpu.memory_space<vmem>>, %arg4: memref<256x640xbf16, #tpu.memory_space<vmem>>, %arg5: memref<1x640xf32, #tpu.memory_space<vmem>>, %arg6: memref<640x256xbf16, #tpu.memory_space<vmem>>, %arg7: memref<1x256xf32, #tpu.memory_space<vmem>>, %arg8: memref<256x128xbf16, #tpu.memory_space<vmem>>, %arg9: memref<1x128xf32, #tpu.memory_space<vmem>>, %arg10: memref<8x128xf32, #tpu.memory_space<vmem>>) attributes {dimension_semantics = [#tpu.dimension_semantics<parallel>], iteration_bounds = array<i64: 1>, scalar_prefetch = 0 : i64, scratch_operands = 0 : i64, tpu.core_type = #tpu.core_type<tc>, window_params = [{transform_indices = @transform_0, window_bounds = array<i64: 8, 32>}, {pipeline_mode = #tpu.pipeline_mode<synchronous>, transform_indices = @transform_1, window_bounds = array<i64: 32, 256>}, {pipeline_mode = #tpu.pipeline_mode<synchronous>, transform_indices = @transform_2, window_bounds = array<i64: 1, 256>}, {pipeline_mode = #tpu.pipeline_mode<synchronous>, transform_indices = @transform_3, window_bounds = array<i64: 256, 640>}, {pipeline_mode = #tpu.pipeline_mode<synchronous>, transform_indices = @transform_4, window_bounds = array<i64: 1, 640>}, {pipeline_mode = #tpu.pipeline_mode<synchronous>, transform_indices = @transform_5, window_bounds = array<i64: 640, 256>}, {pipeline_mode = #tpu.pipeline_mode<synchronous>, transform_indices = @transform_6, window_bounds = array<i64: 1, 256>}, {pipeline_mode = #tpu.pipeline_mode<synchronous>, transform_indices = @transform_7, window_bounds = array<i64: 256, 128>}, {pipeline_mode = #tpu.pipeline_mode<synchronous>, transform_indices = @transform_8, window_bounds = array<i64: 1, 128>}, {transform_indices = @transform_9, window_bounds = array<i64: 8, 128>}]} {
    %c0 = arith.constant 0 : index
    %c0_0 = arith.constant 0 : index
    %0 = vector.load %arg1[%c0, %c0_0] : memref<8x32xf32, #tpu.memory_space<vmem>>, vector<8x32xf32>
    %1 = arith.truncf %0 : vector<8x32xf32> to vector<8x32xbf16>
    %c0_1 = arith.constant 0 : index
    %c0_2 = arith.constant 0 : index
    %2 = vector.load %arg2[%c0_1, %c0_2] : memref<32x256xbf16, #tpu.memory_space<vmem>>, vector<32x256xbf16>
    %cst = arith.constant dense<0.000000e+00> : vector<8x256xf32>
    %3 = tpu.matmul %1, %2, %cst {dimension_numbers = #tpu.dot_dimension_numbers<[1], [0], [0], [1], [0, 0, 1, 1], [], []>} : vector<8x32xbf16>, vector<32x256xbf16>, vector<8x256xf32> -> vector<8x256xf32>
    %c0_3 = arith.constant 0 : index
    %c0_4 = arith.constant 0 : index
    %4 = vector.load %arg3[%c0_3, %c0_4] : memref<1x256xf32, #tpu.memory_space<vmem>>, vector<1x256xf32>
    %5 = vector.broadcast %4 : vector<1x256xf32> to vector<8x256xf32>
    %6 = arith.addf %3, %5 : vector<8x256xf32>
    %cst_5 = arith.constant 0.000000e+00 : f32
    %7 = vector.broadcast %cst_5 : f32 to vector<8x256xf32>
    %8 = arith.maximumf %6, %7 : vector<8x256xf32>
    %9 = arith.truncf %8 : vector<8x256xf32> to vector<8x256xbf16>
    %c0_6 = arith.constant 0 : index
    %c0_7 = arith.constant 0 : index
    %10 = vector.load %arg4[%c0_6, %c0_7] : memref<256x640xbf16, #tpu.memory_space<vmem>>, vector<256x640xbf16>
    %cst_8 = arith.constant dense<0.000000e+00> : vector<8x640xf32>
    %11 = tpu.matmul %9, %10, %cst_8 {dimension_numbers = #tpu.dot_dimension_numbers<[1], [0], [0], [1], [0, 0, 1, 1], [], []>} : vector<8x256xbf16>, vector<256x640xbf16>, vector<8x640xf32> -> vector<8x640xf32>
    %c0_9 = arith.constant 0 : index
    %c0_10 = arith.constant 0 : index
    %12 = vector.load %arg5[%c0_9, %c0_10] : memref<1x640xf32, #tpu.memory_space<vmem>>, vector<1x640xf32>
    %13 = vector.broadcast %12 : vector<1x640xf32> to vector<8x640xf32>
    %14 = arith.addf %11, %13 : vector<8x640xf32>
    %cst_11 = arith.constant 0.000000e+00 : f32
    %15 = vector.broadcast %cst_11 : f32 to vector<8x640xf32>
    %16 = arith.maximumf %14, %15 : vector<8x640xf32>
    %17 = arith.truncf %16 : vector<8x640xf32> to vector<8x640xbf16>
    %c0_12 = arith.constant 0 : index
    %c0_13 = arith.constant 0 : index
    %18 = vector.load %arg6[%c0_12, %c0_13] : memref<640x256xbf16, #tpu.memory_space<vmem>>, vector<640x256xbf16>
    %cst_14 = arith.constant dense<0.000000e+00> : vector<8x256xf32>
    %19 = tpu.matmul %17, %18, %cst_14 {dimension_numbers = #tpu.dot_dimension_numbers<[1], [0], [0], [1], [0, 0, 1, 1], [], []>} : vector<8x640xbf16>, vector<640x256xbf16>, vector<8x256xf32> -> vector<8x256xf32>
    %c0_15 = arith.constant 0 : index
    %c0_16 = arith.constant 0 : index
    %20 = vector.load %arg7[%c0_15, %c0_16] : memref<1x256xf32, #tpu.memory_space<vmem>>, vector<1x256xf32>
    %21 = vector.broadcast %20 : vector<1x256xf32> to vector<8x256xf32>
    %22 = arith.addf %19, %21 : vector<8x256xf32>
    %cst_17 = arith.constant 0.000000e+00 : f32
    %23 = vector.broadcast %cst_17 : f32 to vector<8x256xf32>
    %24 = arith.maximumf %22, %23 : vector<8x256xf32>
    %25 = arith.truncf %24 : vector<8x256xf32> to vector<8x256xbf16>
    %c0_18 = arith.constant 0 : index
    %c0_19 = arith.constant 0 : index
    %26 = vector.load %arg8[%c0_18, %c0_19] : memref<256x128xbf16, #tpu.memory_space<vmem>>, vector<256x128xbf16>
    %cst_20 = arith.constant dense<0.000000e+00> : vector<8x128xf32>
    %27 = tpu.matmul %25, %26, %cst_20 {dimension_numbers = #tpu.dot_dimension_numbers<[1], [0], [0], [1], [0, 0, 1, 1], [], []>} : vector<8x256xbf16>, vector<256x128xbf16>, vector<8x128xf32> -> vector<8x128xf32>
    %c0_21 = arith.constant 0 : index
    %c0_22 = arith.constant 0 : index
    %28 = vector.load %arg9[%c0_21, %c0_22] : memref<1x128xf32, #tpu.memory_space<vmem>>, vector<1x128xf32>
    %29 = vector.broadcast %28 : vector<1x128xf32> to vector<8x128xf32>
    %30 = arith.addf %27, %29 : vector<8x128xf32>
    %c0_23 = arith.constant 0 : index
    %c0_24 = arith.constant 0 : index
    %31 = vector.load %arg10[%c0_23, %c0_24] : memref<8x128xf32, #tpu.memory_space<vmem>>, vector<8x128xf32>
    tpu.vector_store %arg10[%c0_23, %c0_24], %30 {strides = array<i32>} : memref<8x128xf32, #tpu.memory_space<vmem>>, vector<8x128xf32>,
    return
  }
  func.func @transform_0(%arg0: i32) -> (i32, i32) {
    %c0_i32 = arith.constant 0 : i32
    %c0_i32_0 = arith.constant 0 : i32
    return %arg0, %c0_i32 : i32, i32
  }
  func.func @transform_1(%arg0: i32) -> (i32, i32) {
    %c0_i32 = arith.constant 0 : i32
    %c0_i32_0 = arith.constant 0 : i32
    %c0_i32_1 = arith.constant 0 : i32
    return %c0_i32, %c0_i32_0 : i32, i32
  }
  func.func @transform_2(%arg0: i32) -> (i32, i32) {
    %c0_i32 = arith.constant 0 : i32
    %c0_i32_0 = arith.constant 0 : i32
    %c0_i32_1 = arith.constant 0 : i32
    return %c0_i32, %c0_i32_0 : i32, i32
  }
  func.func @transform_3(%arg0: i32) -> (i32, i32) {
    %c0_i32 = arith.constant 0 : i32
    %c0_i32_0 = arith.constant 0 : i32
    %c0_i32_1 = arith.constant 0 : i32
    return %c0_i32, %c0_i32_0 : i32, i32
  }
  func.func @transform_4(%arg0: i32) -> (i32, i32) {
    %c0_i32 = arith.constant 0 : i32
    %c0_i32_0 = arith.constant 0 : i32
    %c0_i32_1 = arith.constant 0 : i32
    return %c0_i32, %c0_i32_0 : i32, i32
  }
  func.func @transform_5(%arg0: i32) -> (i32, i32) {
    %c0_i32 = arith.constant 0 : i32
    %c0_i32_0 = arith.constant 0 : i32
    %c0_i32_1 = arith.constant 0 : i32
    return %c0_i32, %c0_i32_0 : i32, i32
  }
  func.func @transform_6(%arg0: i32) -> (i32, i32) {
    %c0_i32 = arith.constant 0 : i32
    %c0_i32_0 = arith.constant 0 : i32
    %c0_i32_1 = arith.constant 0 : i32
    return %c0_i32, %c0_i32_0 : i32, i32
  }
  func.func @transform_7(%arg0: i32) -> (i32, i32) {
    %c0_i32 = arith.constant 0 : i32
    %c0_i32_0 = arith.constant 0 : i32
    %c0_i32_1 = arith.constant 0 : i32
    return %c0_i32, %c0_i32_0 : i32, i32
  }
  func.func @transform_8(%arg0: i32) -> (i32, i32) {
    %c0_i32 = arith.constant 0 : i32
    %c0_i32_0 = arith.constant 0 : i32
    %c0_i32_1 = arith.constant 0 : i32
    return %c0_i32, %c0_i32_0 : i32, i32
  }
  func.func @transform_9(%arg0: i32) -> (i32, i32) {
    %c0_i32 = arith.constant 0 : i32
    %c0_i32_0 = arith.constant 0 : i32
    return %arg0, %c0_i32 : i32, i32
  }
}

</mosaic_0001>

<bundles_post_ra>
// kernel: ann_relu_forward.1
= control target key start
LH: loop header
LB: loop body
LE: loop exit
PB: predicated region body
PF: predicated region fallthrough
CT: control target
= control target key end

     0   :  { %14 = vsyncpa [#allocation3], 0  ;;  %s2496_s0 = inlined_call_operand.hbm [shape: f32[8,32], index: 0, kind: input, shape index: {}]   ;;  %s2497_s1 = inlined_call_operand.hbm [shape: bf16[32,256], index: 1, kind: input, shape index: {}]   ;;  %s2498_s2 = inlined_call_operand.vmem [shape: f32[1,256], index: 2, kind: input, shape index: {}]   ;;  %s2499_s3 = inlined_call_operand.hbm [shape: bf16[256,640], index: 3, kind: input, shape index: {}]   ;;  %s2500_s4 = inlined_call_operand.vmem [shape: f32[1,640], index: 4, kind: input, shape index: {}]   ;;  %s2501_s5 = inlined_call_operand.hbm [shape: bf16[640,256], index: 5, kind: input, shape index: {}]   ;;  %s2502_s6 = inlined_call_operand.vmem [shape: f32[1,256], index: 6, kind: input, shape index: {}]   ;;  %s2503_s7 = inlined_call_operand.hbm [shape: bf16[256,128], index: 7, kind: input, shape index: {}]   ;;  %s2504_s8 = inlined_call_operand.vmem [shape: f32[1,128], index: 8, kind: input, shape index: {}]   ;;  %s2505_s9 = inlined_call_operand.hbm [shape: f32[8,128], index: 9, kind: output, shape index: {}]  }
   0x1   :  { %15 = vsyncpa [#allocation6], 0 }
   0x2   :  { %16 = vsyncpa [#allocation9], 0 }
   0x3   :  { %17 = vsyncpa [#allocation4], 0  ;;  %s2313_s30 = smov [#allocation5]   ;;  %s2173_s13 = scalar_lea.hbm %s2497_s1, 512 }
   0x4   :  { %s33_s10 = sshll.u32 %s2313_s30, 4  ;;  %p2174_p0 = scmp.ne.s32.totalorder %s2497_s1, %s2173_s13  ;;  %s34_s10 = int_to_ptr.vmem [resolvable:$true] %s33_s10 }
   0x5   :  { %p2177_p1 = scmp.lt.u32.totalorder %s2173_s13, %s2497_s1 }
   0x7   :  { %p2179_p2 = pnand %p2177_p1, %p2174_p0 }
   0x9   :  { %2182 = shalt.err (!%p2179_p2)
}
   0xa   :  { %s2183_s18 = scalar_lea.vmem %s34_s10, 512  ;;  %p2188_p4 = scmp.lt.s32.totalorder %s34_s10, %s34_s10 }
   0xb   :  { %p2184_p3 = scmp.ne.s32.totalorder %s34_s10, %s2183_s18  ;;  %p2189_p5 = scmp.lt.s32.totalorder %s2183_s18, %s2183_s18 }
   0xd   :  { %p2190_p6 = por %p2189_p5, %p2188_p4 }
   0xf   :  { %p2191_p7 = pnand %p2190_p6, %p2184_p3 }
  0x11   :  { %2194 = shalt.err (!%p2191_p7)
}
  0x12   :  { %s2314_s19 = smov 128   ;;  %s2315_s20 = smov 8  }
  0x13   :  { %39 = dma.hbm_to_vmem [thread:$0]  %s2497_s1, 512, %s34_s10, [#allocation6], %s2314_s19, %s2314_s19, %s2315_s20  }
  0x14   :  { %s2316_s23 = smov [#allocation8]   ;;  %s2317_s25 = smov [#allocation2]  }
  0x15   :  { %s61_s24 = sshll.u32 %s2316_s23, 4  ;;  %s24_s26 = sshll.u32 %s2317_s25, 4  ;;  %s62_s24 = int_to_ptr.vmem [resolvable:$true] %s61_s24  ;;  %s25_s26 = int_to_ptr.vmem [resolvable:$true] %s24_s26 }
  0x16   :  { %s2195_s29 = scalar_lea.hbm %s2501_s5, 10240 }
  0x17   :  { %p2196_p8 = scmp.ne.s32.totalorder %s2501_s5, %s2195_s29  ;;  %p2199_p9 = scmp.lt.u32.totalorder %s2195_s29, %s2501_s5 }
  0x19   :  { %p2201_p10 = pnand %p2199_p9, %p2196_p8 }
  0x1b   :  { %2204 = shalt.err (!%p2201_p10)
}
  0x1c   :  { %s2205_s1 = scalar_lea.vmem %s62_s24, 10240  ;;  %p2210_p12 = scmp.lt.s32.totalorder %s62_s24, %s62_s24 }
  0x1d   :  { %p2206_p11 = scmp.ne.s32.totalorder %s62_s24, %s2205_s1  ;;  %p2211_p13 = scmp.lt.s32.totalorder %s2205_s1, %s2205_s1 }
  0x1f   :  { %p2212_p0 = por %p2211_p13, %p2210_p12 }
  0x21   :  { %p2213_p1 = pnand %p2212_p0, %p2206_p11 }
  0x23   :  { %2216 = shalt.err (!%p2213_p1)
}
  0x24   :  { %67 = dma.hbm_to_vmem [thread:$0]  %s2501_s5, 10240, %s62_s24, [#allocation9], %s2314_s19, %s2314_s19, %s2315_s20  }
  0x25   :  { %s2217_s17 = scalar_lea.hbm %s2496_s0, 128 }
  0x26   :  { %p2218_p2 = scmp.ne.s32.totalorder %s2496_s0, %s2217_s17  ;;  %p2221_p3 = scmp.lt.u32.totalorder %s2217_s17, %s2496_s0 }
  0x28   :  { %p2223_p4 = pnand %p2221_p3, %p2218_p2 }
  0x2a   :  { %2226 = shalt.err (!%p2223_p4)
}
  0x2b   :  { %s2227_s25 = scalar_lea.vmem %s25_s26, 128  ;;  %p2232_p6 = scmp.lt.s32.totalorder %s25_s26, %s25_s26 }
  0x2c   :  { %p2228_p5 = scmp.ne.s32.totalorder %s25_s26, %s2227_s25  ;;  %p2233_p7 = scmp.lt.s32.totalorder %s2227_s25, %s2227_s25 }
  0x2e   :  { %p2234_p8 = por %p2233_p7, %p2232_p6 }
  0x30   :  { %p2235_p9 = pnand %p2234_p8, %p2228_p5 }
  0x32   :  { %2238 = shalt.err (!%p2235_p9)
}
  0x33   :  { %27 = dma.hbm_to_vmem [thread:$0]  %s2496_s0, 128, %s25_s26, [#allocation3]  }
  0x34   :  { %s2318_s20 = smov [#allocation7]   ;;  %s2239_s29 = scalar_lea.hbm %s2499_s3, 10240 }
  0x35   :  { %s47_s24 = sshll.u32 %s2318_s20, 4  ;;  %p2240_p10 = scmp.ne.s32.totalorder %s2499_s3, %s2239_s29  ;;  %s48_s24 = int_to_ptr.vmem [resolvable:$true] %s47_s24 }
  0x36   :  { %p2243_p11 = scmp.lt.u32.totalorder %s2239_s29, %s2499_s3 }
  0x38   :  { %p2245_p12 = pnand %p2243_p11, %p2240_p10 }
  0x3a   :  { %2248 = shalt.err (!%p2245_p12)
}
  0x3b   :  { %s2249_s1 = scalar_lea.vmem %s48_s24, 10240  ;;  %p2254_p0 = scmp.lt.s32.totalorder %s48_s24, %s48_s24 }
  0x3c   :  { %p2250_p13 = scmp.ne.s32.totalorder %s48_s24, %s2249_s1  ;;  %p2255_p1 = scmp.lt.s32.totalorder %s2249_s1, %s2249_s1 }
  0x3e   :  { %p2256_p2 = por %p2255_p1, %p2254_p0 }
  0x40   :  { %p2257_p3 = pnand %p2256_p2, %p2250_p13 }
  0x42   :  { %2260 = shalt.err (!%p2257_p3)
}
  0x43   :  { %s2319_s0 = smov 320   ;;  %s2320_s26 = smov 20  }
  0x44   :  { %53 = dma.hbm_to_vmem [thread:$0]  %s2499_s3, 10240, %s48_s24, [#allocation6], %s2319_s0, %s2319_s0, %s2320_s26  }
  0x45   :  { %s2321_s15 = smov [#allocation10]   ;;  %s2261_s21 = scalar_lea.hbm %s2503_s7, 2048 }
  0x46   :  { %s75_s16 = sshll.u32 %s2321_s15, 4  ;;  %p2262_p4 = scmp.ne.s32.totalorder %s2503_s7, %s2261_s21  ;;  %s76_s16 = int_to_ptr.vmem [resolvable:$true] %s75_s16 }
  0x47   :  { %p2265_p5 = scmp.lt.u32.totalorder %s2261_s21, %s2503_s7 }
  0x49   :  { %p2267_p6 = pnand %p2265_p5, %p2262_p4 }
  0x4b   :  { %2270 = shalt.err (!%p2267_p6)
}
  0x4c   :  { %s2271_s19 = scalar_lea.vmem %s76_s16, 2048  ;;  %p2276_p8 = scmp.lt.s32.totalorder %s76_s16, %s76_s16 }
  0x4d   :  { %p2272_p7 = scmp.ne.s32.totalorder %s76_s16, %s2271_s19  ;;  %p2277_p9 = scmp.lt.s32.totalorder %s2271_s19, %s2271_s19 }
  0x4f   :  { %p2278_p10 = por %p2277_p9, %p2276_p8 }
  0x51   :  { %p2279_p11 = pnand %p2278_p10, %p2272_p7 }
  0x53   :  { %2282 = shalt.err (!%p2279_p11)
}
  0x54   :  { %s2322_s3 = smov 64   ;;  %s2323_s20 = smov 4  }
  0x55   :  { %81 = dma.hbm_to_vmem [thread:$0]  %s2503_s7, 2048, %s76_s16, [#allocation9], %s2322_s3, %s2322_s3, %s2323_s20  }
  0x56   :  { %2305 = dma.done.wait [#allocation3], 128  }
  0x57   :  { %2306 = vsyncadd [#allocation3], 4294967168 }
  0x58   :  { %2307 = dma.done.wait [#allocation6], 10752  }
  0x59   :  { %2308 = vsyncadd [#allocation6], 4294956544 }
  0x5a   :  { %2309 = dma.done.wait [#allocation9], 12288  }
  0x5b   :  { %2310 = vsyncadd [#allocation9], 4294955008  ;;  %v2324_v0 = vmov 0   ;;  %v1919_v1 = vld [vmem:[#allocation5 + $0x4] ss:$8 sps:$4 sm:$0xff]   ;;  %v100_v5 = vld [vmem:[#allocation2] sm:$0xff]  ;;  %v108_v46 = vlaneseq }
  0x5c   :  { %174 = vmatprep.mubr.bf16.mxu0 %v2324_v0  ;;  %v1921_v2 = vld [vmem:[#allocation5] ss:$8 sps:$4 sm:$0xff]   ;;  %142 = vmatprep.subr.bf16.mxu0 %v1919_v1  ;;  %v1922_v3 = vld [vmem:[#allocation5 + $0x14] ss:$8 sps:$4 sm:$0xff]   ;;  %v1924_v4 = vld [vmem:[#allocation5 + $0x10] ss:$8 sps:$4 sm:$0xff]   ;;  %v101_v9 = vpack.c.bf16 %v100_v5, %v100_v5 }
  0x5d   :  { %143 = vmatpush1.bf16.msra.mxu0 %v1921_v2  ;;  %v1925_v6 = vld [vmem:[#allocation7 + $0x4] ss:$20 sps:$4 sm:$0xff]   ;;  %v1927_v7 = vld [vmem:[#allocation7] ss:$20 sps:$4 sm:$0xff]   ;;  %v1930_v10 = vld [vmem:[#allocation7 + $0x28] ss:$20 sps:$4 sm:$0xff]  }
  0x5e   :  { %144 = vmatprep.subr.bf16.mxu0 %v1922_v3  ;;  %726 = vmatprep.subr.bf16.mxu1 %v1925_v6  ;;  %v1928_v8 = vld [vmem:[#allocation7 + $0x2c] ss:$20 sps:$4 sm:$0xff]   ;;  %vm138_vm0 = vcmask 261120   ;;  %v1931_v11 = vld [vmem:[#allocation7 + $0x54] ss:$20 sps:$4 sm:$0xff]   ;;  %v2437_v49 = vshrl.u32 %v108_v46, 7 }
  0x5f   :  { %727 = vmatpush1.bf16.msra.mxu1 %v1927_v7  ;;  %v1933_v12 = vld [vmem:[#allocation7 + $0x50] ss:$20 sps:$4 sm:$0xff]   ;;  %v1936_v14 = vld [vmem:[#allocation7 + $0x78] ss:$20 sps:$4 sm:$0xff]   ;;  %v1939_v16 = vld [vmem:[#allocation7 + $0xa0] ss:$20 sps:$4 sm:$0xff]  }
  0x60   :  { %728 = vmatprep.subr.bf16.mxu1 %v1928_v8  ;;  %v1934_v13 = vld [vmem:[#allocation7 + $0x7c] ss:$20 sps:$4 sm:$0xff]   ;;  %v1937_v15 = vld [vmem:[#allocation7 + $0xa4] ss:$20 sps:$4 sm:$0xff]   ;;  %v1940_v17 = vld [vmem:[#allocation7 + $0xcc] ss:$20 sps:$4 sm:$0xff]  }
  0x61   :  { %145 = vmatpush1.bf16.msra.mxu0 %v1924_v4  ;;  %v1942_v18 = vld [vmem:[#allocation7 + $0xc8] ss:$20 sps:$4 sm:$0xff]   ;;  %v1945_v20 = vld [vmem:[#allocation7 + $0xf0] ss:$20 sps:$4 sm:$0xff]   ;;  %v1948_v22 = vld [vmem:[#allocation7 + $0x118] ss:$20 sps:$4 sm:$0xff]  }
  0x62   :  { %v1943_v19 = vld [vmem:[#allocation7 + $0xf4] ss:$20 sps:$4 sm:$0xff]   ;;  %v1946_v21 = vld [vmem:[#allocation7 + $0x11c] ss:$20 sps:$4 sm:$0xff]   ;;  %v1949_v23 = vld [vmem:[#allocation7 + $0x144] ss:$20 sps:$4 sm:$0xff]  }
  0x63   :  { %729 = vmatpush1.bf16.msra.mxu1 %v1930_v10  ;;  %v1951_v24 = vld [vmem:[#allocation7 + $0x140] ss:$20 sps:$4 sm:$0xff]   ;;  %v1954_v26 = vld [vmem:[#allocation7 + $0x168] ss:$20 sps:$4 sm:$0xff]   ;;  %v1957_v28 = vld [vmem:[#allocation7 + $0x190] ss:$20 sps:$4 sm:$0xff]  }
  0x64   :  { %1674 = vmatmul.mubr.msk.bf16.vlgmr.msra.gmra.mrb[0].mxu0 %vm138_vm0, %v101_v9  ;;  %730 = vmatprep.subr.bf16.mxu1 %v1931_v11  ;;  %v1952_v25 = vld [vmem:[#allocation7 + $0x16c] ss:$20 sps:$4 sm:$0xff]   ;;  %v1955_v27 = vld [vmem:[#allocation7 + $0x194] ss:$20 sps:$4 sm:$0xff]   ;;  %v1958_v29 = vld [vmem:[#allocation7 + $0x1bc] ss:$20 sps:$4 sm:$0xff]  }
  0x65   :  { %v1960_v30 = vld [vmem:[#allocation7 + $0x1b8] ss:$20 sps:$4 sm:$0xff]   ;;  %v1963_v32 = vld [vmem:[#allocation7 + $0x1e0] ss:$20 sps:$4 sm:$0xff]   ;;  %v1966_v34 = vld [vmem:[#allocation7 + $0x208] ss:$20 sps:$4 sm:$0xff]  }
  0x66   :  { %v1961_v31 = vld [vmem:[#allocation7 + $0x1e4] ss:$20 sps:$4 sm:$0xff]   ;;  %v1964_v33 = vld [vmem:[#allocation7 + $0x20c] ss:$20 sps:$4 sm:$0xff]   ;;  %v1967_v35 = vld [vmem:[#allocation7 + $0x234] ss:$20 sps:$4 sm:$0xff]  }
  0x67   :  { %731 = vmatpush1.bf16.msra.mxu1 %v1933_v12  ;;  %v1969_v36 = vld [vmem:[#allocation7 + $0x230] ss:$20 sps:$4 sm:$0xff]   ;;  %v1972_v38 = vld [vmem:[#allocation7 + $0x258] ss:$20 sps:$4 sm:$0xff]   ;;  %v2037_v40 = vld [vmem:[#allocation8] ss:$8 sps:$4 sm:$0xff]  }
  0x68   :  { %732 = vmatprep.subr.bf16.mxu1 %v1934_v13  ;;  %v1970_v37 = vld [vmem:[#allocation7 + $0x25c] ss:$20 sps:$4 sm:$0xff]   ;;  %v1975_v39 = vld [vmem:[#allocation7 + $0xc] ss:$20 sps:$4 sm:$0xff]   ;;  %v2440_v52 = vsub.s32 0, %v2437_v49  ;;  %v2446_v55 = vsub.s32 1, %v2437_v49 }
  0x69   :  { %v2039_v41 = vld [vmem:[#allocation8 + $0x4] ss:$8 sps:$4 sm:$0xff]   ;;  %v2042_v42 = vld [vmem:[#allocation8 + $0x14] ss:$8 sps:$4 sm:$0xff]   ;;  %v2040_v43 = vld [vmem:[#allocation8 + $0x10] ss:$8 sps:$4 sm:$0xff]  }
  0x6a   :  { %1350 = vmatprep.subr.bf16.mxu0 %v2039_v41  ;;  %v2045_v44 = vld [vmem:[#allocation8 + $0x24] ss:$8 sps:$4 sm:$0xff]   ;;  %v2043_v45 = vld [vmem:[#allocation8 + $0x20] ss:$8 sps:$4 sm:$0xff]   ;;  %v2048_v47 = vld [vmem:[#allocation8 + $0x34] ss:$8 sps:$4 sm:$0xff]  }
  0x6b   :  { %733 = vmatpush1.bf16.msra.mxu1 %v1936_v14  ;;  %1351 = vmatpush1.bf16.msra.mxu0 %v2037_v40  ;;  %v2046_v48 = vld [vmem:[#allocation8 + $0x30] ss:$8 sps:$4 sm:$0xff]   ;;  %v2051_v50 = vld [vmem:[#allocation8 + $0x44] ss:$8 sps:$4 sm:$0xff]   ;;  %v2049_v51 = vld [vmem:[#allocation8 + $0x40] ss:$8 sps:$4 sm:$0xff]  }
  0x6c   :  { %734 = vmatprep.subr.bf16.mxu1 %v1937_v15  ;;  %1352 = vmatprep.subr.bf16.mxu0 %v2042_v42  ;;  %v2054_v53 = vld [vmem:[#allocation8 + $0x54] ss:$8 sps:$4 sm:$0xff]   ;;  %v106_v54 = vld [vmem:[%s2498_s2] sm:$0x3]  ;;  %v2057_v58 = vld [vmem:[#allocation8 + $0x64] ss:$8 sps:$4 sm:$0xff]  }
  0x6d   :  { %v2052_v56 = vld [vmem:[#allocation8 + $0x50] ss:$8 sps:$4 sm:$0xff]   ;;  %v111_v57 = vrot.slane %v106_v54, %v2440_v52  ;;  %v115_v59 = vrot.slane %v106_v54, %v2446_v55  ;;  %v2055_v61 = vld [vmem:[#allocation8 + $0x60] ss:$8 sps:$4 sm:$0xff]   ;;  %v2060_v1 = vld [vmem:[#allocation8 + $0x74] ss:$8 sps:$4 sm:$0xff]  }
  0x6e   :  { %v2058_v7 = vld [vmem:[#allocation8 + $0x70] ss:$8 sps:$4 sm:$0xff]   ;;  %v2063_v8 = vld [vmem:[#allocation8 + $0x84] ss:$8 sps:$4 sm:$0xff]   ;;  %v1973_v10 = vld [vmem:[#allocation7 + $0x8] ss:$20 sps:$4 sm:$0xff]  }
  0x6f   :  { %735 = vmatpush1.bf16.msra.mxu1 %v1939_v16  ;;  %1353 = vmatpush1.bf16.msra.mxu0 %v2040_v43  ;;  %v1978_v12 = vld [vmem:[#allocation7 + $0x34] ss:$20 sps:$4 sm:$0xff]   ;;  %v1976_v15 = vld [vmem:[#allocation7 + $0x30] ss:$20 sps:$4 sm:$0xff]   ;;  %v2003_v42 = vld [vmem:[#allocation7 + $0x198] ss:$20 sps:$4 sm:$0xff]  }
  0x70   :  { %736 = vmatprep.subr.bf16.mxu1 %v1940_v17  ;;  %1354 = vmatprep.subr.bf16.mxu0 %v2045_v44  ;;  %v2061_v13 = vld [vmem:[#allocation8 + $0x80] ss:$8 sps:$4 sm:$0xff]   ;;  %v2066_v14 = vld [vmem:[#allocation8 + $0x94] ss:$8 sps:$4 sm:$0xff]   ;;  %v2064_v17 = vld [vmem:[#allocation8 + $0x90] ss:$8 sps:$4 sm:$0xff]  }
  0x71   :  { %v1981_v16 = vld [vmem:[#allocation7 + $0x5c] ss:$20 sps:$4 sm:$0xff]   ;;  %v2008_v43 = vld [vmem:[#allocation7 + $0x1c4] ss:$20 sps:$4 sm:$0xff]   ;;  %v2006_v44 = vld [vmem:[#allocation7 + $0x1c0] ss:$20 sps:$4 sm:$0xff]  }
  0x72   :  { %v2000_v40 = vld [vmem:[#allocation7 + $0x170] ss:$20 sps:$4 sm:$0xff]   ;;  %v2009_v46 = vld [vmem:[#allocation7 + $0x1e8] ss:$20 sps:$4 sm:$0xff]   ;;  %v2018_v54 = vld [vmem:[#allocation7 + $0x260] ss:$20 sps:$4 sm:$0xff]  }
  0x73   :  { %737 = vmatpush1.bf16.msra.mxu1 %v1942_v18  ;;  %1355 = vmatpush1.bf16.msra.mxu0 %v2043_v45  ;;  %v2069_v18 = vld [vmem:[#allocation8 + $0xa4] ss:$8 sps:$4 sm:$0xff]   ;;  %v2005_v41 = vld [vmem:[#allocation7 + $0x19c] ss:$20 sps:$4 sm:$0xff]  }
  0x74   :  { %738 = vmatprep.subr.bf16.mxu1 %v1943_v19  ;;  %1356 = vmatprep.subr.bf16.mxu0 %v2048_v47  ;;  %v1979_v19 = vld [vmem:[#allocation7 + $0x58] ss:$20 sps:$4 sm:$0xff]   ;;  %v2014_v47 = vld [vmem:[#allocation7 + $0x214] ss:$20 sps:$4 sm:$0xff]  }
  0x75   :  { %v2011_v45 = vld [vmem:[#allocation7 + $0x1ec] ss:$20 sps:$4 sm:$0xff]  }
  0x77   :  { %739 = vmatpush1.bf16.msra.mxu1 %v1945_v20  ;;  %1357 = vmatpush1.bf16.msra.mxu0 %v2046_v48  ;;  %v1984_v20 = vld [vmem:[#allocation7 + $0x84] ss:$20 sps:$4 sm:$0xff]  }
  0x78   :  { %740 = vmatprep.subr.bf16.mxu1 %v1946_v21  ;;  %1358 = vmatprep.subr.bf16.mxu0 %v2051_v50  ;;  %v2067_v21 = vld [vmem:[#allocation8 + $0xa0] ss:$8 sps:$4 sm:$0xff]   ;;  %v2012_v48 = vld [vmem:[#allocation7 + $0x210] ss:$20 sps:$4 sm:$0xff]  }
  0x79   :  { %v2017_v50 = vld [vmem:[#allocation7 + $0x23c] ss:$20 sps:$4 sm:$0xff]  }
  0x7b   :  { %741 = vmatpush1.bf16.msra.mxu1 %v1948_v22  ;;  %1359 = vmatpush1.bf16.msra.mxu0 %v2049_v51  ;;  %v2072_v22 = vld [vmem:[#allocation8 + $0xb4] ss:$8 sps:$4 sm:$0xff]   ;;  %v2015_v51 = vld [vmem:[#allocation7 + $0x238] ss:$20 sps:$4 sm:$0xff]  }
  0x7c   :  { %742 = vmatprep.subr.bf16.mxu1 %v1949_v23  ;;  %1360 = vmatprep.subr.bf16.mxu0 %v2054_v53  ;;  %v1982_v23 = vld [vmem:[#allocation7 + $0x80] ss:$20 sps:$4 sm:$0xff]   ;;  %v2020_v53 = vld [vmem:[#allocation7 + $0x264] ss:$20 sps:$4 sm:$0xff]  }
  0x7f   :  { %743 = vmatpush1.bf16.msra.mxu1 %v1951_v24  ;;  %1361 = vmatpush1.bf16.msra.mxu0 %v2052_v56  ;;  %v1987_v24 = vld [vmem:[#allocation7 + $0xac] ss:$20 sps:$4 sm:$0xff]   ;;  %v2021_v56 = vld [vmem:[#allocation7 + $0x150] ss:$20 sps:$4 sm:$0xff]  }
  0x80   :  { %744 = vmatprep.subr.bf16.mxu1 %v1952_v25  ;;  %1362 = vmatprep.subr.bf16.mxu0 %v2057_v58  ;;  %v2070_v25 = vld [vmem:[#allocation8 + $0xb0] ss:$8 sps:$4 sm:$0xff]  }
  0x81   :  { %v2023_v58 = vld [vmem:[#allocation7 + $0x178] ss:$20 sps:$4 sm:$0xff]  }
  0x83   :  { %745 = vmatpush1.bf16.msra.mxu1 %v1954_v26  ;;  %1363 = vmatpush1.bf16.msra.mxu0 %v2055_v61  ;;  %v2075_v26 = vld [vmem:[#allocation8 + $0xc4] ss:$8 sps:$4 sm:$0xff]   ;;  %v2026_v61 = vld [vmem:[#allocation7 + $0x60] ss:$20 sps:$4 sm:$0xff]  }
  0x84   :  { %746 = vmatprep.subr.bf16.mxu1 %v1955_v27  ;;  %1364 = vmatprep.subr.bf16.mxu0 %v2060_v1  ;;  %v1985_v27 = vld [vmem:[#allocation7 + $0xa8] ss:$20 sps:$4 sm:$0xff]   ;;  %v2029_v1 = vld [vmem:[#allocation7 + $0x1f0] ss:$20 sps:$4 sm:$0xff]  }
  0x87   :  { %747 = vmatpush1.bf16.msra.mxu1 %v1957_v28  ;;  %1365 = vmatpush1.bf16.msra.mxu0 %v2058_v7  ;;  %v1990_v28 = vld [vmem:[#allocation7 + $0xd4] ss:$20 sps:$4 sm:$0xff]  }
  0x88   :  { %748 = vmatprep.subr.bf16.mxu1 %v1958_v29  ;;  %1366 = vmatprep.subr.bf16.mxu0 %v2063_v8  ;;  %v2073_v29 = vld [vmem:[#allocation8 + $0xc0] ss:$8 sps:$4 sm:$0xff]  }
  0x89   :  { %v2079_v7 = vld [vmem:[#allocation8 + $0xe0] ss:$8 sps:$4 sm:$0xff]  }
  0x8a   :  { %v2034_v8 = vld [vmem:[#allocation7 + $0x100] ss:$20 sps:$4 sm:$0xff]  }
  0x8b   :  { %749 = vmatpush1.bf16.msra.mxu1 %v1960_v30  ;;  %1367 = vmatpush1.bf16.msra.mxu0 %v2061_v13  ;;  %v2078_v30 = vld [vmem:[#allocation8 + $0xd4] ss:$8 sps:$4 sm:$0xff]  }
  0x8c   :  { %750 = vmatprep.subr.bf16.mxu1 %v1961_v31  ;;  %1368 = vmatprep.subr.bf16.mxu0 %v2066_v14  ;;  %v1988_v31 = vld [vmem:[#allocation7 + $0xd0] ss:$20 sps:$4 sm:$0xff]   ;;  %v2036_v13 = vld [vmem:[#allocation7 + $0x128] ss:$20 sps:$4 sm:$0xff]  }
  0x8d   :  { %v2087_v14 = vld [vmem:[#allocation8 + $0x104] ss:$8 sps:$4 sm:$0xff]  }
  0x8f   :  { %751 = vmatpush1.bf16.msra.mxu1 %v1963_v32  ;;  %1369 = vmatpush1.bf16.msra.mxu0 %v2064_v17  ;;  %v1993_v32 = vld [vmem:[#allocation7 + $0xfc] ss:$20 sps:$4 sm:$0xff]   ;;  %v2159_v17 = vld [vmem:[#allocation10 + $0x48] sm:$0xff]  }
  0x90   :  { %752 = vmatprep.subr.bf16.mxu1 %v1964_v33  ;;  %1370 = vmatprep.subr.bf16.mxu0 %v2069_v18  ;;  %v2076_v33 = vld [vmem:[#allocation8 + $0xd0] ss:$8 sps:$4 sm:$0xff]   ;;  %v2160_v18 = vld [vmem:[#allocation10 + $0x8] sm:$0xff]  }
  0x93   :  { %753 = vmatpush1.bf16.msra.mxu1 %v1966_v34  ;;  %1371 = vmatpush1.bf16.msra.mxu0 %v2067_v21  ;;  %v1991_v34 = vld [vmem:[#allocation7 + $0xf8] ss:$20 sps:$4 sm:$0xff]  }
  0x94   :  { %754 = vmatprep.subr.bf16.mxu1 %v1967_v35  ;;  %1372 = vmatprep.subr.bf16.mxu0 %v2072_v22  ;;  %v1996_v35 = vld [vmem:[#allocation7 + $0x124] ss:$20 sps:$4 sm:$0xff]  }
  0x95   :  { %v2163_v21 = vld [vmem:[#allocation10 + $0x58] sm:$0xff]  }
  0x96   :  { %v2164_v22 = vld [vmem:[#allocation10 + $0x18] sm:$0xff]  }
  0x97   :  { %755 = vmatpush1.bf16.msra.mxu1 %v1969_v36  ;;  %1373 = vmatpush1.bf16.msra.mxu0 %v2070_v25  ;;  %v1994_v36 = vld [vmem:[#allocation7 + $0x120] ss:$20 sps:$4 sm:$0xff]   ;;  %v2167_v25 = vld [vmem:[#allocation10 + $0x68] sm:$0xff]  }
  0x98   :  { %756 = vmatprep.subr.bf16.mxu1 %v1970_v37  ;;  %1374 = vmatprep.subr.bf16.mxu0 %v2075_v26  ;;  %v1999_v37 = vld [vmem:[#allocation7 + $0x14c] ss:$20 sps:$4 sm:$0xff]  }
  0x9b   :  { %757 = vmatpush1.bf16.msra.mxu1 %v1972_v38  ;;  %1375 = vmatpush1.bf16.msra.mxu0 %v2073_v29  ;;  %v1997_v38 = vld [vmem:[#allocation7 + $0x148] ss:$20 sps:$4 sm:$0xff]  }
  0x9c   :  { %767 = vmatprep.subr.bf16.mxu1 %v1975_v39  ;;  %1376 = vmatprep.subr.bf16.mxu0 %v2078_v30  ;;  %v2002_v39 = vld [vmem:[#allocation7 + $0x174] ss:$20 sps:$4 sm:$0xff]  }
  0x9f   :  { %1377 = vmatpush1.bf16.msra.mxu0 %v2076_v33 }
 0x137   :  { %v176_v60 = vpop.f32.mrb[0].mxu0 }
 0x138   :  { %v177_v62 = vadd.f32 %v176_v60, %v111_v57  ;;  %v178_v63 = vpop.f32.mrb[1].mxu0  ;;  %v2022_v57 = vld [vmem:[#allocation7 + $0x10] ss:$20 sps:$4 sm:$0xff]   ;;  %v2025_v60 = vld [vmem:[#allocation7 + $0x1a0] ss:$20 sps:$4 sm:$0xff]  }
 0x139   :  { %v179_v2 = vadd.f32 %v178_v63, %v115_v59  ;;  %v180_v3 = vpop.f32.mrb[2].mxu0  ;;  %v2024_v59 = vld [vmem:[#allocation7 + $0x38] ss:$20 sps:$4 sm:$0xff]   ;;  %v2028_v63 = vld [vmem:[#allocation7 + $0x88] ss:$20 sps:$4 sm:$0xff]  }
 0x13a   :  { %v183_v4 = vmax.f32 %v177_v62, 0.0  ;;  %v181_v5 = vpop.f32.mrb[3].mxu0  ;;  %v2027_v62 = vld [vmem:[#allocation7 + $0x1c8] ss:$20 sps:$4 sm:$0xff]   ;;  %v2031_v3 = vld [vmem:[#allocation7 + $0x218] ss:$20 sps:$4 sm:$0xff]  }
 0x13b   :  { %v184_v6 = vmax.f32 %v179_v2, 0.0  ;;  %v2030_v2 = vld [vmem:[#allocation7 + $0xb0] ss:$20 sps:$4 sm:$0xff]   ;;  %v2033_v5 = vld [vmem:[#allocation7 + $0x240] ss:$20 sps:$4 sm:$0xff]  }
 0x13c   :  { %v2452_v11 = vpack.c.bf16 %v183_v4, %v183_v4  ;;  %v2032_v4 = vld [vmem:[#allocation7 + $0xd8] ss:$20 sps:$4 sm:$0xff]  }
 0x13d   :  { %v2450_v9 = vpack.c.bf16 %v184_v6, %v184_v6  ;;  %v2081_v6 = vld [vmem:[#allocation8 + $0xe4] ss:$8 sps:$4 sm:$0xff]  }
 0x13e   :  { %1378 = vmatprep.subr.bf16.mxu0 %v2081_v6  ;;  %v2124_v6 = vld [vmem:[#allocation8 + $0x1d0] ss:$8 sps:$4 sm:$0xff]  }
 0x13f   :  { %758 = vmatprep.mubr.bf16.mxu1 %v2450_v9  ;;  %1379 = vmatpush1.bf16.msra.mxu0 %v2079_v7  ;;  %v299_v7 = vsub.s32 3, %v2437_v49 }
 0x140   :  { %759 = vmatmul.mubr.bf16.vlgmr.msra.gmra.mrb[0].mxu1 %v2452_v11 }
 0x141   :  { %768 = vmatpush1.bf16.msra.mxu1 %v1973_v10  ;;  %799 = vmatprep.mubr.bf16.mxu1 %v2450_v9  ;;  %v2084_v10 = vld [vmem:[#allocation8 + $0xf4] ss:$8 sps:$4 sm:$0xff]  }
 0x142   :  { %769 = vmatprep.subr.bf16.mxu1 %v1978_v12  ;;  %v2082_v12 = vld [vmem:[#allocation8 + $0xf0] ss:$8 sps:$4 sm:$0xff]   ;;  %1380 = vmatprep.subr.bf16.mxu0 %v2084_v10 }
 0x143   :  { %1381 = vmatpush1.bf16.msra.mxu0 %v2082_v12  ;;  %v2127_v12 = vld [vmem:[#allocation8 + $0x1e0] ss:$8 sps:$4 sm:$0xff]  }
 0x144   :  { %1391 = vmatprep.subr.bf16.mxu0 %v2087_v14 }
 0x145   :  { %770 = vmatpush1.bf16.msra.mxu1 %v1976_v15  ;;  %v2157_v15 = vld [vmem:[#allocation10 + $0x40] sm:$0xff]  }
 0x146   :  { %771 = vmatprep.subr.bf16.mxu1 %v1981_v16  ;;  %v2158_v16 = vld [vmem:[#allocation10] sm:$0xff]  }
 0x149   :  { %772 = vmatpush1.bf16.msra.mxu1 %v1979_v19  ;;  %v2161_v19 = vld [vmem:[#allocation10 + $0x50] sm:$0xff]  }
 0x14a   :  { %773 = vmatprep.subr.bf16.mxu1 %v1984_v20  ;;  %v2162_v20 = vld [vmem:[#allocation10 + $0x10] sm:$0xff]  }
 0x14d   :  { %774 = vmatpush1.bf16.msra.mxu1 %v1982_v23  ;;  %v2165_v23 = vld [vmem:[#allocation10 + $0x60] sm:$0xff]  }
 0x14e   :  { %775 = vmatprep.subr.bf16.mxu1 %v1987_v24  ;;  %v2166_v24 = vld [vmem:[#allocation10 + $0x20] sm:$0xff]  }
 0x151   :  { %776 = vmatpush1.bf16.msra.mxu1 %v1985_v27  ;;  %v2168_v27 = vld [vmem:[#allocation10 + $0x28] sm:$0xff]  }
 0x152   :  { %777 = vmatprep.subr.bf16.mxu1 %v1990_v28 }
 0x155   :  { %778 = vmatpush1.bf16.msra.mxu1 %v1988_v31 }
 0x156   :  { %779 = vmatprep.subr.bf16.mxu1 %v1993_v32 }
 0x159   :  { %780 = vmatpush1.bf16.msra.mxu1 %v1991_v34 }
 0x15a   :  { %781 = vmatprep.subr.bf16.mxu1 %v1996_v35 }
 0x15d   :  { %782 = vmatpush1.bf16.msra.mxu1 %v1994_v36 }
 0x15e   :  { %783 = vmatprep.subr.bf16.mxu1 %v1999_v37 }
 0x161   :  { %784 = vmatpush1.bf16.msra.mxu1 %v1997_v38  ;;  %v2085_v38 = vld [vmem:[#allocation8 + $0x100] ss:$8 sps:$4 sm:$0xff]  }
 0x162   :  { %785 = vmatprep.subr.bf16.mxu1 %v2002_v39 }
 0x165   :  { %786 = vmatpush1.bf16.msra.mxu1 %v2000_v40  ;;  %v2090_v40 = vld [vmem:[#allocation8 + $0x114] ss:$8 sps:$4 sm:$0xff]  }
 0x166   :  { %787 = vmatprep.subr.bf16.mxu1 %v2005_v41  ;;  %v2088_v41 = vld [vmem:[#allocation8 + $0x110] ss:$8 sps:$4 sm:$0xff]  }
 0x169   :  { %788 = vmatpush1.bf16.msra.mxu1 %v2003_v42  ;;  %v2093_v42 = vld [vmem:[#allocation8 + $0x124] ss:$8 sps:$4 sm:$0xff]  }
 0x16a   :  { %789 = vmatprep.subr.bf16.mxu1 %v2008_v43  ;;  %v2091_v43 = vld [vmem:[#allocation8 + $0x120] ss:$8 sps:$4 sm:$0xff]  }
 0x16d   :  { %790 = vmatpush1.bf16.msra.mxu1 %v2006_v44  ;;  %v2096_v44 = vld [vmem:[#allocation8 + $0x134] ss:$8 sps:$4 sm:$0xff]  }
 0x16e   :  { %791 = vmatprep.subr.bf16.mxu1 %v2011_v45  ;;  %v2094_v45 = vld [vmem:[#allocation8 + $0x130] ss:$8 sps:$4 sm:$0xff]  }
 0x171   :  { %792 = vmatpush1.bf16.msra.mxu1 %v2009_v46  ;;  %v2099_v46 = vld [vmem:[#allocation8 + $0x144] ss:$8 sps:$4 sm:$0xff]  }
 0x172   :  { %793 = vmatprep.subr.bf16.mxu1 %v2014_v47  ;;  %v2097_v47 = vld [vmem:[#allocation8 + $0x140] ss:$8 sps:$4 sm:$0xff]  }
 0x175   :  { %794 = vmatpush1.bf16.msra.mxu1 %v2012_v48  ;;  %v2102_v48 = vld [vmem:[#allocation8 + $0x154] ss:$8 sps:$4 sm:$0xff]  }
 0x176   :  { %795 = vmatprep.subr.bf16.mxu1 %v2017_v50  ;;  %v2100_v50 = vld [vmem:[#allocation8 + $0x150] ss:$8 sps:$4 sm:$0xff]  }
 0x179   :  { %796 = vmatpush1.bf16.msra.mxu1 %v2015_v51  ;;  %v2105_v51 = vld [vmem:[#allocation8 + $0x164] ss:$8 sps:$4 sm:$0xff]  }
 0x17a   :  { %797 = vmatprep.subr.bf16.mxu1 %v2020_v53  ;;  %v2103_v53 = vld [vmem:[#allocation8 + $0x160] ss:$8 sps:$4 sm:$0xff]  }
 0x17d   :  { %798 = vmatpush1.bf16.msra.mxu1 %v2018_v54  ;;  %v2108_v54 = vld [vmem:[#allocation8 + $0x174] ss:$8 sps:$4 sm:$0xff]  }
 0x17e   :  { %1852 = vmatprep.subr.bf16.mxu1 %v2021_v56  ;;  %v2106_v56 = vld [vmem:[#allocation8 + $0x170] ss:$8 sps:$4 sm:$0xff]  }
 0x180   :  { %800 = vmatmul.mubr.bf16.vlgmr.msra.gmra.mrb[4].mxu1 %v2452_v11 }
 0x181   :  { %1853 = vmatpush3.bf16.msra.mxu1 %v2022_v57  ;;  %840 = vmatprep.mubr.bf16.mxu1 %v2450_v9  ;;  %v2035_v9 = vld [vmem:[#allocation7 + $0x268] ss:$20 sps:$4 sm:$0xff]   ;;  %v2111_v57 = vld [vmem:[#allocation8 + $0x184] ss:$8 sps:$4 sm:$0xff]  }
 0x182   :  { %1854 = vmatprep.subr.bf16.mxu1 %v2023_v58  ;;  %v2109_v58 = vld [vmem:[#allocation8 + $0x180] ss:$8 sps:$4 sm:$0xff]  }
 0x185   :  { %1855 = vmatpush3.bf16.msra.mxu1 %v2024_v59  ;;  %v2114_v59 = vld [vmem:[#allocation8 + $0x194] ss:$8 sps:$4 sm:$0xff]  }
 0x186   :  { %1856 = vmatprep.subr.bf16.mxu1 %v2025_v60  ;;  %v2112_v60 = vld [vmem:[#allocation8 + $0x190] ss:$8 sps:$4 sm:$0xff]  }
 0x189   :  { %1857 = vmatpush3.bf16.msra.mxu1 %v2026_v61  ;;  %v2117_v61 = vld [vmem:[#allocation8 + $0x1a4] ss:$8 sps:$4 sm:$0xff]  }
 0x18a   :  { %1858 = vmatprep.subr.bf16.mxu1 %v2027_v62  ;;  %v2115_v62 = vld [vmem:[#allocation8 + $0x1a0] ss:$8 sps:$4 sm:$0xff]  }
 0x18d   :  { %1859 = vmatpush3.bf16.msra.mxu1 %v2028_v63  ;;  %v2120_v63 = vld [vmem:[#allocation8 + $0x1b4] ss:$8 sps:$4 sm:$0xff]  }
 0x18e   :  { %1860 = vmatprep.subr.bf16.mxu1 %v2029_v1  ;;  %v2118_v1 = vld [vmem:[#allocation8 + $0x1b0] ss:$8 sps:$4 sm:$0xff]  }
 0x191   :  { %1861 = vmatpush3.bf16.msra.mxu1 %v2030_v2  ;;  %v2123_v2 = vld [vmem:[#allocation8 + $0x1c4] ss:$8 sps:$4 sm:$0xff]  }
 0x192   :  { %1862 = vmatprep.subr.bf16.mxu1 %v2031_v3  ;;  %v2121_v3 = vld [vmem:[#allocation8 + $0x1c0] ss:$8 sps:$4 sm:$0xff]  }
 0x195   :  { %1863 = vmatpush3.bf16.msra.mxu1 %v2032_v4  ;;  %v2126_v4 = vld [vmem:[#allocation8 + $0x1d4] ss:$8 sps:$4 sm:$0xff]  }
 0x196   :  { %1864 = vmatprep.subr.bf16.mxu1 %v2033_v5  ;;  %v295_v5 = vsub.s32 2, %v2437_v49 }
 0x199   :  { %1865 = vmatpush3.bf16.msra.mxu1 %v2034_v8  ;;  %v2129_v8 = vld [vmem:[#allocation8 + $0x1e4] ss:$8 sps:$4 sm:$0xff]  }
 0x19a   :  { %1866 = vmatprep.subr.bf16.mxu1 %v2035_v9 }
 0x19d   :  { %1867 = vmatpush3.bf16.msra.mxu1 %v2036_v13  ;;  %v2132_v13 = vld [vmem:[#allocation8 + $0x1f4] ss:$8 sps:$4 sm:$0xff]  }
 0x19e   :  { %1874 = vmatprep.subr.bf16.mxu1 %v2157_v15 }
 0x1a0   :  { %841 = vmatmul.mubr.bf16.vlgmr.msra.gmra.mrb[8].mxu1 %v2452_v11  ;;  %v2463_v11 = vld [vmem:[%s2500_s4] sm:$0x1f] }
 0x1a1   :  { %1875 = vmatpush3.bf16.msra.mxu1 %v2158_v16  ;;  %v288_v26 = vrot.slane %v2463_v11, %v2440_v52  ;;  %v292_v28 = vrot.slane %v2463_v11, %v2446_v55  ;;  %v296_v9 = vrot.slane %v2463_v11, %v295_v5  ;;  %v300_v10 = vrot.slane %v2463_v11, %v299_v7 }
 0x1a2   :  { %1876 = vmatprep.subr.bf16.mxu1 %v2159_v17 }
 0x1a5   :  { %1877 = vmatpush3.bf16.msra.mxu1 %v2160_v18 }
 0x1a6   :  { %1878 = vmatprep.subr.bf16.mxu1 %v2161_v19  ;;  %v2130_v19 = vld [vmem:[#allocation8 + $0x1f0] ss:$8 sps:$4 sm:$0xff]  }
 0x1a9   :  { %1879 = vmatpush3.bf16.msra.mxu1 %v2162_v20 }
 0x1aa   :  { %1880 = vmatprep.subr.bf16.mxu1 %v2163_v21 }
 0x1ad   :  { %1881 = vmatpush3.bf16.msra.mxu1 %v2164_v22  ;;  %v2135_v22 = vld [vmem:[#allocation8 + $0x204] ss:$8 sps:$4 sm:$0xff]  }
 0x1ae   :  { %1882 = vmatprep.subr.bf16.mxu1 %v2165_v23 }
 0x1b1   :  { %1883 = vmatpush3.bf16.msra.mxu1 %v2166_v24 }
 0x1b2   :  { %1884 = vmatprep.subr.bf16.mxu1 %v2167_v25  ;;  %v2133_v25 = vld [vmem:[#allocation8 + $0x200] ss:$8 sps:$4 sm:$0xff]  }
 0x1b5   :  { %1885 = vmatpush3.bf16.msra.mxu1 %v2168_v27  ;;  %v2138_v27 = vld [vmem:[#allocation8 + $0x214] ss:$8 sps:$4 sm:$0xff]  }
 0x213   :  { %v760_v29 = vpop.f32.mrb[0].mxu1 }
 0x214   :  { %v761_v30 = vadd.f32 %v760_v29, %v288_v26  ;;  %v762_v31 = vpop.f32.mrb[1].mxu1  ;;  %v2141_v29 = vld [vmem:[#allocation8 + $0x224] ss:$8 sps:$4 sm:$0xff]  }
 0x215   :  { %v763_v32 = vadd.f32 %v762_v31, %v292_v28  ;;  %v764_v33 = vpop.f32.mrb[2].mxu1  ;;  %v2136_v28 = vld [vmem:[#allocation8 + $0x210] ss:$8 sps:$4 sm:$0xff]   ;;  %v2144_v31 = vld [vmem:[#allocation8 + $0x234] ss:$8 sps:$4 sm:$0xff]  }
 0x216   :  { %v848_v34 = vmax.f32 %v761_v30, 0.0  ;;  %v765_v35 = vpop.f32.mrb[3].mxu1  ;;  %v2139_v30 = vld [vmem:[#allocation8 + $0x220] ss:$8 sps:$4 sm:$0xff]   ;;  %v2147_v33 = vld [vmem:[#allocation8 + $0x244] ss:$8 sps:$4 sm:$0xff]  }
 0x217   :  { %v849_v36 = vmax.f32 %v763_v32, 0.0  ;;  %v2142_v32 = vld [vmem:[#allocation8 + $0x230] ss:$8 sps:$4 sm:$0xff]   ;;  %v2150_v35 = vld [vmem:[#allocation8 + $0x254] ss:$8 sps:$4 sm:$0xff]  }
 0x218   :  { %v853_v39 = vpack.c.bf16 %v848_v34, %v848_v34  ;;  %v2145_v34 = vld [vmem:[#allocation8 + $0x240] ss:$8 sps:$4 sm:$0xff]  }
 0x219   :  { %v854_v37 = vpack.c.bf16 %v849_v36, %v849_v36  ;;  %v2148_v36 = vld [vmem:[#allocation8 + $0x250] ss:$8 sps:$4 sm:$0xff]  }
 0x21b   :  { %1382 = vmatprep.mubr.bf16.mxu0 %v854_v37  ;;  %v2153_v37 = vld [vmem:[#allocation8 + $0x264] ss:$8 sps:$4 sm:$0xff]  }
 0x21c   :  { %1383 = vmatmul.mubr.bf16.vlgmr.msra.gmra.mrb[4].mxu0 %v853_v39  ;;  %v2156_v39 = vld [vmem:[#allocation8 + $0x274] ss:$8 sps:$4 sm:$0xff]  }
 0x21d   :  { %1392 = vmatpush1.bf16.msra.mxu0 %v2085_v38  ;;  %v2151_v38 = vld [vmem:[#allocation8 + $0x260] ss:$8 sps:$4 sm:$0xff]  }
 0x21e   :  { %1393 = vmatprep.subr.bf16.mxu0 %v2090_v40 }
 0x221   :  { %1394 = vmatpush1.bf16.msra.mxu0 %v2088_v41 }
 0x222   :  { %1395 = vmatprep.subr.bf16.mxu0 %v2093_v42 }
 0x225   :  { %1396 = vmatpush1.bf16.msra.mxu0 %v2091_v43 }
 0x226   :  { %1397 = vmatprep.subr.bf16.mxu0 %v2096_v44 }
 0x229   :  { %1398 = vmatpush1.bf16.msra.mxu0 %v2094_v45  ;;  %v2154_v45 = vld [vmem:[#allocation8 + $0x270] ss:$8 sps:$4 sm:$0xff]  }
 0x22a   :  { %1399 = vmatprep.subr.bf16.mxu0 %v2099_v46 }
 0x22d   :  { %1400 = vmatpush1.bf16.msra.mxu0 %v2097_v47 }
 0x22e   :  { %1401 = vmatprep.subr.bf16.mxu0 %v2102_v48 }
 0x231   :  { %1402 = vmatpush1.bf16.msra.mxu0 %v2100_v50 }
 0x232   :  { %1403 = vmatprep.subr.bf16.mxu0 %v2105_v51  ;;  %v2170_v51 = vld [vmem:[#allocation10 + $0x30] sm:$0xff]  }
 0x235   :  { %1404 = vmatpush1.bf16.msra.mxu0 %v2103_v53  ;;  %v2171_v53 = vld [vmem:[#allocation10 + $0x78] sm:$0xff]  }
 0x236   :  { %1405 = vmatprep.subr.bf16.mxu0 %v2108_v54  ;;  %v2172_v54 = vld [vmem:[#allocation10 + $0x38] sm:$0xff]  }
 0x239   :  { %1406 = vmatpush1.bf16.msra.mxu0 %v2106_v56 }
 0x23a   :  { %1407 = vmatprep.subr.bf16.mxu0 %v2111_v57 }
 0x23d   :  { %1408 = vmatpush1.bf16.msra.mxu0 %v2109_v58 }
 0x23e   :  { %1409 = vmatprep.subr.bf16.mxu0 %v2114_v59 }
 0x241   :  { %1410 = vmatpush1.bf16.msra.mxu0 %v2112_v60 }
 0x242   :  { %1411 = vmatprep.subr.bf16.mxu0 %v2117_v61 }
 0x245   :  { %1412 = vmatpush1.bf16.msra.mxu0 %v2115_v62 }
 0x246   :  { %1413 = vmatprep.subr.bf16.mxu0 %v2120_v63 }
 0x249   :  { %1414 = vmatpush1.bf16.msra.mxu0 %v2118_v1 }
 0x24a   :  { %1415 = vmatprep.subr.bf16.mxu0 %v2123_v2 }
 0x24d   :  { %1416 = vmatpush1.bf16.msra.mxu0 %v2121_v3 }
 0x24e   :  { %1417 = vmatprep.subr.bf16.mxu0 %v2126_v4 }
 0x251   :  { %1418 = vmatpush1.bf16.msra.mxu0 %v2124_v6  ;;  %v1835_v6 = vld [vmem:[%s2504_s8] ss:$0 sm:$0xff] }
 0x252   :  { %1419 = vmatprep.subr.bf16.mxu0 %v2129_v8 }
 0x253   :  { %v801_v14 = vpop.f32.mrb[4].mxu1 }
 0x254   :  { %v802_v15 = vadd.f32 %v801_v14, %v296_v9  ;;  %v803_v16 = vpop.f32.mrb[5].mxu1 }
 0x255   :  { %v804_v17 = vadd.f32 %v803_v16, %v300_v10  ;;  %v805_v18 = vpop.f32.mrb[6].mxu1  ;;  %1420 = vmatpush1.bf16.msra.mxu0 %v2127_v12 }
 0x256   :  { %v850_v20 = vmax.f32 %v802_v15, 0.0  ;;  %v806_v21 = vpop.f32.mrb[7].mxu1  ;;  %1421 = vmatprep.subr.bf16.mxu0 %v2132_v13 }
 0x257   :  { %v851_v23 = vmax.f32 %v804_v17, 0.0 }
 0x258   :  { %v855_v26 = vpack.c.bf16 %v850_v20, %v850_v20 }
 0x259   :  { %v856_v24 = vpack.c.bf16 %v851_v23, %v851_v23  ;;  %1422 = vmatpush1.bf16.msra.mxu0 %v2130_v19 }
 0x25a   :  { %1432 = vmatprep.subr.bf16.mxu0 %v2135_v22 }
 0x25b   :  { %1423 = vmatprep.mubr.bf16.mxu0 %v856_v24 }
 0x25c   :  { %1424 = vmatmul.mubr.bf16.vlgmr.msra.gmra.mrb[4].mxu0 %v855_v26 }
 0x25d   :  { %1433 = vmatpush1.bf16.msra.mxu0 %v2133_v25  ;;  %1464 = vmatprep.mubr.bf16.mxu0 %v2324_v0  ;;  %v303_v0 = vsub.s32 4, %v2437_v49  ;;  %v2169_v49 = vld [vmem:[#allocation10 + $0x70] sm:$0xff]  }
 0x25e   :  { %1434 = vmatprep.subr.bf16.mxu0 %v2138_v27  ;;  %1886 = vmatprep.subr.bf16.mxu1 %v2169_v49 }
 0x25f   :  { %v304_v41 = vrot.slane %v2463_v11, %v303_v0  ;;  %1887 = vmatpush3.bf16.msra.mxu1 %v2170_v51  ;;  %v938_v11 = vld [vmem:[%s2502_s6] sm:$0x3]  ;;  %s2325_s6 = smov [#allocation11]  }
 0x260   :  { %1888 = vmatprep.subr.bf16.mxu1 %v2171_v53  ;;  %v943_v56 = vrot.slane %v938_v11, %v2440_v52  ;;  %v947_v57 = vrot.slane %v938_v11, %v2446_v55  ;;  %s1659_s13 = sshll.u32 %s2325_s6, 4  ;;  %s1660_s13 = int_to_ptr.vmem [resolvable:$true] %s1659_s13 }
 0x261   :  { %1435 = vmatpush1.bf16.msra.mxu0 %v2136_v28  ;;  %s2283_s1 = scalar_lea.vmem %s1660_s13, 128  ;;  %p2288_p13 = scmp.lt.s32.totalorder %s1660_s13, %s1660_s13 }
 0x262   :  { %1436 = vmatprep.subr.bf16.mxu0 %v2141_v29  ;;  %p2284_p12 = scmp.ne.s32.totalorder %s1660_s13, %s2283_s1  ;;  %p2289_p0 = scmp.lt.s32.totalorder %s2283_s1, %s2283_s1 }
 0x263   :  { %1889 = vmatpush3.bf16.msra.mxu1 %v2172_v54 }
 0x264   :  { %p2290_p1 = por %p2289_p0, %p2288_p13 }
 0x265   :  { %1437 = vmatpush1.bf16.msra.mxu0 %v2139_v30 }
 0x266   :  { %1438 = vmatprep.subr.bf16.mxu0 %v2144_v31  ;;  %p2291_p2 = pnand %p2290_p1, %p2284_p12 }
 0x269   :  { %1439 = vmatpush1.bf16.msra.mxu0 %v2142_v32 }
 0x26a   :  { %1440 = vmatprep.subr.bf16.mxu0 %v2147_v33 }
 0x26d   :  { %1441 = vmatpush1.bf16.msra.mxu0 %v2145_v34 }
 0x26e   :  { %1442 = vmatprep.subr.bf16.mxu0 %v2150_v35 }
 0x271   :  { %1443 = vmatpush1.bf16.msra.mxu0 %v2148_v36 }
 0x272   :  { %1444 = vmatprep.subr.bf16.mxu0 %v2153_v37 }
 0x273   :  { %v1868_v40 = vpop.f32.mrb[8].mxu1 }
 0x274   :  { %v1869_v42 = vpop.f32.mrb[9].mxu1 }
 0x275   :  { %v1870_v43 = vadd.f32 %v1869_v42, %v1868_v40  ;;  %v1871_v44 = vpop.f32.mrb[10].mxu1  ;;  %1445 = vmatpush1.bf16.msra.mxu0 %v2151_v38 }
 0x276   :  { %v1872_v46 = vpop.f32.mrb[11].mxu1  ;;  %1446 = vmatprep.subr.bf16.mxu0 %v2156_v39 }
 0x277   :  { %v843_v47 = vadd.f32 %v1870_v43, %v304_v41 }
 0x279   :  { %v852_v48 = vmax.f32 %v843_v47, 0.0  ;;  %1447 = vmatpush1.bf16.msra.mxu0 %v2154_v45 }
 0x27b   :  { %v857_v50 = vpack.c.bf16 %v852_v48, %v852_v48 }
 0x27d   :  { %1465 = vmatmul.mubr.bf16.vlgmr.msra.gmra.mrb[4].mxu0 %v857_v50 }
 0x350   :  { %v1466_v58 = vpop.f32.mrb[4].mxu0 }
 0x351   :  { %v1896_v59 = vadd.f32 %v1466_v58, %v943_v56  ;;  %v1468_v60 = vpop.f32.mrb[5].mxu0 }
 0x352   :  { %v1897_v61 = vadd.f32 %v1468_v60, %v947_v57  ;;  %v1470_v62 = vpop.f32.mrb[6].mxu0 }
 0x353   :  { %v1473_v63 = vmax.f32 %v1896_v59, 0.0  ;;  %v1471_v1 = vpop.f32.mrb[7].mxu0 }
 0x354   :  { %v1474_v2 = vmax.f32 %v1897_v61, 0.0 }
 0x355   :  { %v1475_v4 = vpack.c.bf16 %v1473_v63, %v1473_v63 }
 0x356   :  { %v1476_v3 = vpack.c.bf16 %v1474_v2, %v1474_v2 }
 0x358   :  { %1644 = vmatprep.mubr.bf16.mxu1 %v1476_v3 }
 0x359   :  { %1645 = vmatmul.mubr.bf16.vlgmr.msra.gmra.mrb[12].mxu1 %v1475_v4 }
 0x42c   :  { %v1890_v5 = vpop.f32.mrb[12].mxu1 }
 0x42d   :  { %v1891_v52 = vpop.f32.mrb[13].mxu1 }
 0x42e   :  { %v1892_v55 = vadd.f32 %v1891_v52, %v1890_v5  ;;  %v1893_v7 = vpop.f32.mrb[14].mxu1 }
 0x42f   :  { %v1894_v8 = vpop.f32.mrb[15].mxu1 }
 0x430   :  { %v1647_v9 = vadd.f32 %v1892_v55, %v1835_v6 }
 0x432   :  { %1652 = vst [vmem:[#allocation11] sm:$0xff] %v1647_v9 }
 0x433   :  { %2294 = shalt.err (!%p2291_p2)
}
 0x434   :  { %s2295_s8 = scalar_lea.hbm %s2505_s9, 128 }
 0x435   :  { %p2296_p3 = scmp.ne.s32.totalorder %s2505_s9, %s2295_s8  ;;  %p2299_p4 = scmp.lt.u32.totalorder %s2295_s8, %s2505_s9 }
 0x437   :  { %p2301_p5 = pnand %p2299_p4, %p2296_p3 }
 0x439   :  { %2304 = shalt.err (!%p2301_p5)
}
 0x43a   :  { %1662 = dma.vmem_to_hbm [thread:$0]  %s1660_s13, 128, %s2505_s9, [#allocation4]  }
 0x43b   :  { %2311 = dma.done.wait [#allocation4], 128  }
 0x43c   :  { %2312 = vsyncadd [#allocation4], 4294967168 }
 0x43d   :  { %1666 = vsyncpa [#allocation3], 1 }
 0x43e   :  { %1667 = vsyncpa [#allocation6], 1 }
 0x43f   :  { %1668 = vsyncpa [#allocation9], 1 }
 0x440   :  { %1669 = vsyncpa [#allocation4], 1 }

</bundles_post_ra>
